<compile_context>
chip_gen: v7x
topology: tpu7x:2x2x1
jax: 0.10.0
libtpu: 0.0.40
codegen_flags: <defaults>
</compile_context>

<pallas_src>
import functools

import jax
import jax.numpy as jnp
from jax.experimental import pallas as pl
from jax.experimental.pallas import tpu as pltpu


# ---------------------------------------------------------------------------
# Hardware-aware sizing helpers.
# ---------------------------------------------------------------------------
def _tpu_vmem_bytes():
    try:
        return int(pltpu.get_tpu_info().vmem_capacity_bytes)
    except Exception:
        return 128 << 20  # v5e/v6e default if the query is unavailable


def _vmem_limit(step_bytes, cap):
    # step_bytes = single-buffered bytes for one grid step; Pallas double
    # buffers, plus slack for weights / gate / compiler-internal scratch.
    return int(min(cap, max(16 << 20, 2 * step_bytes + (4 << 20))))


def _pick_tile_hw(HW, C, itemsize, vmem_budget, want_spatial_parallel):
    # Per-step working set = 4*C*tile*itemsize (x0 + x1 + 2C out).  Target
    # ~4 MiB (=> ~8 MiB double-buffered): mem-bound tiles need >= ~1 MiB per
    # block to reach ~85% of the HBM roofline.
    target = min(4 << 20, max(1 << 20, vmem_budget // 8))
    tile = (target // (4 * C * itemsize) // 128) * 128
    hw_up = ((HW + 127) // 128) * 128
    tile = min(max(tile, 512), hw_up)
    if want_spatial_parallel and hw_up >= 256:
        # keep >= 2 spatial tiles so both TensorCores (v7x) get work
        half = ((((HW + 1) // 2) + 127) // 128) * 128
        tile = min(tile, max(128, half))
    return max(128, int(tile))


# ---------------------------------------------------------------------------
# Path A: fused single-pass kernel (SE gate computed in-kernel).
#   One HBM read of x0/x1 and one write of out — minimum-traffic schedule.
# ---------------------------------------------------------------------------
def cgfm_fused_kernel(x0_ref, x1_ref, w1_ref, w2_ref, out_ref, *, inv_hw):
    # x0_ref / x1_ref : (1, C, HW)    activations, native dtype (f32 or bf16)
    # w1_ref          : (hidden, 2C)  SE fc1 weight (f32, no bias)
    # w2_ref          : (2C, hidden)  SE fc2 weight (f32, no bias)
    # out_ref         : (1, 2, C, HW) two output halves
    x0 = x0_ref[0]                       # (C, HW)
    x1 = x1_ref[0]
    C, HW = x0.shape

    # --- SE gate.  Global average pool as an MXU matvec against ones: bf16
    # inputs accumulate in f32 natively on the MXU, so no full-tile f32
    # upcast temporary is materialized (keeps VMEM footprint = native dtype).
    ones = jnp.ones((HW, 1), dtype=x0.dtype)
    p0 = jnp.dot(x0, ones, preferred_element_type=jnp.float32) * inv_hw   # (C,1)
    p1 = jnp.dot(x1, ones, preferred_element_type=jnp.float32) * inv_hw   # (C,1)
    pooled = jnp.concatenate([p0, p1], axis=0)                            # (2C,1)
    # Tiny N=1 FCs (hidden = 2C/16): negligible FLOPs, f32 throughout.
    h = jnp.maximum(
        jnp.dot(w1_ref[...], pooled, preferred_element_type=jnp.float32), 0.0)
    g = jax.nn.sigmoid(
        jnp.dot(w2_ref[...], h, preferred_element_type=jnp.float32))      # (2C,1)
    g0 = g[:C, :].astype(x0.dtype)       # gate for channels [0, C)
    g1 = g[C:, :].astype(x1.dtype)       # gate for channels [C, 2C)

    # --- apply: each half is written to its own leading-dim slot (no concat,
    # no sublane-boundary masked stores); first half fully stored before the
    # second is touched (short live ranges).
    out_ref[0, 0] = (x0 + x1 * (x1 * g1)).astype(out_ref.dtype)
    out_ref[0, 1] = (x1 + x0 * (x0 * g0)).astype(out_ref.dtype)


def _cgfm_fused(x0f, x1f, w1, w2, vmem_cap):
    B, C, HW = x0f.shape
    itemsize = jnp.dtype(x0f.dtype).itemsize
    step_bytes = 4 * C * HW * itemsize            # x0 + x1 + out(2C) per step
    weight_bytes = (w1.size + w2.size) * 4
    kernel = functools.partial(cgfm_fused_kernel, inv_hw=1.0 / float(HW))
    return pl.pallas_call(
        kernel,
        out_shape=jax.ShapeDtypeStruct((B, 2, C, HW), x0f.dtype),
        grid_spec=pltpu.PrefetchScalarGridSpec(
            num_scalar_prefetch=0,
            grid=(B,),
            in_specs=[
                pl.BlockSpec((1, C, HW), lambda b: (b, 0, 0)),
                pl.BlockSpec((1, C, HW), lambda b: (b, 0, 0)),
                pl.BlockSpec(w1.shape, lambda b: (0, 0)),   # weights resident
                pl.BlockSpec(w2.shape, lambda b: (0, 0)),
            ],
            out_specs=pl.BlockSpec((1, 2, C, HW), lambda b: (b, 0, 0, 0)),
        ),
        compiler_params=pltpu.CompilerParams(
            dimension_semantics=("parallel",),
            vmem_limit_bytes=_vmem_limit(step_bytes, vmem_cap),
        ),
        cost_estimate=pl.CostEstimate(
            flops=int(B * 10 * C * HW),
            transcendentals=int(B * 2 * C),
            bytes_accessed=int(B * step_bytes + weight_bytes),
        ),
    )(x0f, x1f, w1, w2)


# ---------------------------------------------------------------------------
# Path B: gate pre-pass (plain XLA) + spatially tiled elementwise apply.
#   Used when the whole image does not fit the fused VMEM budget, or on v7x
#   with a tiny batch so both TensorCores get work via the 2-D parallel grid.
# ---------------------------------------------------------------------------
def cgfm_apply_kernel(x0_ref, x1_ref, g_ref, out_ref):
    # x0_ref / x1_ref : (1, C, T)     spatial tile, native dtype
    # g_ref           : (1, 2, C, 1)  per-image SE gate (f32)
    # out_ref         : (1, 2, C, T)
    x0 = x0_ref[0]
    x1 = x1_ref[0]
    g0 = g_ref[0, 0].astype(x0.dtype)    # (C, 1)
    g1 = g_ref[0, 1].astype(x1.dtype)
    out_ref[0, 0] = (x0 + x1 * (x1 * g1)).astype(out_ref.dtype)
    out_ref[0, 1] = (x1 + x0 * (x0 * g0)).astype(out_ref.dtype)


def _cgfm_split(x0f, x1f, w1, w2, tile_hw, vmem_cap):
    B, C, HW = x0f.shape

    # Gate pre-pass in plain XLA: mean pool + two tiny FCs + sigmoid.  Keeps
    # the serial pool->fc->fc->sigmoid chain off the per-tile kernel critical
    # path.  Always f32.
    p0 = jnp.mean(x0f.astype(jnp.float32), axis=-1)               # (B, C)
    p1 = jnp.mean(x1f.astype(jnp.float32), axis=-1)               # (B, C)
    pooled = jnp.concatenate([p0, p1], axis=1)                    # (B, 2C)
    h = jnp.maximum(pooled @ w1.astype(jnp.float32).T, 0.0)       # (B, hidden)
    gate = jax.nn.sigmoid(h @ w2.astype(jnp.float32).T)           # (B, 2C)
    gate = gate.reshape(B, 2, C, 1)                               # [b,0]=g0 [b,1]=g1

    n_tiles = pl.cdiv(HW, tile_hw)                # partial last tile is masked
    itemsize = jnp.dtype(x0f.dtype).itemsize
    step_bytes = 4 * C * tile_hw * itemsize
    return pl.pallas_call(
        cgfm_apply_kernel,
        out_shape=jax.ShapeDtypeStruct((B, 2, C, HW), x0f.dtype),
        grid_spec=pltpu.PrefetchScalarGridSpec(
            num_scalar_prefetch=0,
            grid=(B, n_tiles),
            in_specs=[
                pl.BlockSpec((1, C, tile_hw), lambda b, t: (b, 0, t)),
                pl.BlockSpec((1, C, tile_hw), lambda b, t: (b, 0, t)),
                pl.BlockSpec((1, 2, C, 1), lambda b, t: (b, 0, 0, 0)),
            ],
            out_specs=pl.BlockSpec((1, 2, C, tile_hw), lambda b, t: (b, 0, 0, t)),
        ),
        compiler_params=pltpu.CompilerParams(
            dimension_semantics=("parallel", "parallel"),
            vmem_limit_bytes=_vmem_limit(step_bytes, vmem_cap),
        ),
        cost_estimate=pl.CostEstimate(
            flops=int(B * 6 * C * HW),
            transcendentals=0,
            bytes_accessed=int(B * 4 * C * HW * itemsize + B * 2 * C * 4),
        ),
    )(x0f, x1f, gate)


# ---------------------------------------------------------------------------
# Wrapper.
# ---------------------------------------------------------------------------
def context_guide_fusion(x0_nchw, x1_nchw, w1, w2, *, tile_hw=None,
                         force_split=False, force_fused=False):
    """ContextGuideFusionModule forward. x0/x1: (B, C, H, W) -> (B, 2C, H, W)."""
    B, C, H, W = x0_nchw.shape
    assert x1_nchw.shape == (B, C, H, W)
    HW = H * W
    itemsize = jnp.dtype(x0_nchw.dtype).itemsize
    x0f = x0_nchw.reshape(B, C, HW)                  # unpadded, no HBM copies
    x1f = x1_nchw.reshape(B, C, HW)

    # Generation-aware budgets: v7x has 64 MiB VMEM per TensorCore; v5e/v6e
    # have 128 MiB (default scoped limit is lower, so we always set it).
    vmem_phys = _tpu_vmem_bytes()
    is_small_vmem = vmem_phys <= (80 << 20)          # v7x-class
    vmem_cap = (46 << 20) if is_small_vmem else (110 << 20)
    fused_budget = (38 << 20) if is_small_vmem else (96 << 20)

    weight_bytes = (w1.size + w2.size) * 4
    fused_resident = 2 * 4 * C * HW * itemsize + 2 * weight_bytes  # double-buffered

    if force_fused:
        use_split = False
    elif force_split:
        use_split = True
    else:
        use_split = fused_resident > fused_budget
        # v7x: grid=(B,) can't feed both TensorCores for a tiny batch; the
        # 2-D parallel split grid can.
        if is_small_vmem and B < 4:
            use_split = True

    if use_split:
        if tile_hw is None:
            tile_hw = _pick_tile_hw(HW, C, itemsize, fused_budget,
                                    want_spatial_parallel=(is_small_vmem and B < 4))
        out = _cgfm_split(x0f, x1f, w1, w2, tile_hw, vmem_cap)
    else:
        out = _cgfm_fused(x0f, x1f, w1, w2, vmem_cap)
    # (B, 2, C, HW) -> (B, 2C, H, W): contiguous reshape, no data movement.
    return out.reshape(B, 2 * C, H, W)


def reference(x0, x1, w1, w2):
    # Pure-JAX reference of the PyTorch forward (inc[0]==inc[1], ouc==2C).
    B, C, H, W = x0.shape
    xc = jnp.concatenate([x0, x1], axis=1)                        # (B, 2C, H, W)
    pooled = jnp.mean(xc, axis=(2, 3))                            # (B, 2C)
    h = jnp.maximum(pooled @ w1.T, 0.0)                           # (B, hidden)
    gate = jax.nn.sigmoid(h @ w2.T)[:, :, None, None]             # (B, 2C, 1, 1)
    xc = xc * gate
    x0w = x0 * xc[:, :C]
    x1w = x1 * xc[:, C:]
    return jnp.concatenate([x0 + x1w, x1 + x0w], axis=1)


if __name__ == "__main__":
    key = jax.random.PRNGKey(0)

    # --- Case 1: C=32 per branch, 16x16 map (SE bottleneck 2C//16 = 4). ----
    B, C, H, W = 2, 32, 16, 16
    ch, hidden = 2 * C, max(1, (2 * C) // 16)
    k0, k1, k2, k3 = jax.random.split(key, 4)
    x0 = jax.random.normal(k0, (B, C, H, W), dtype=jnp.float32)
    x1 = jax.random.normal(k1, (B, C, H, W), dtype=jnp.float32)
    w1 = jax.random.normal(k2, (hidden, ch), dtype=jnp.float32) * 0.1
    w2 = jax.random.normal(k3, (ch, hidden), dtype=jnp.float32) * 0.1
    ref = reference(x0, x1, w1, w2)

    # default path selection (fused on v5e/v6e, split on v7x small batch)
    out = jax.block_until_ready(context_guide_fusion(x0, x1, w1, w2))
    assert out.shape == (B, 2 * C, H, W)
    assert jnp.allclose(out, ref, atol=1e-5, rtol=1e-5), "default path mismatch"

    # explicit fused path
    out_f = jax.block_until_ready(
        context_guide_fusion(x0, x1, w1, w2, force_fused=True))
    assert jnp.allclose(out_f, ref, atol=1e-5, rtol=1e-5), "fused path mismatch"

    # explicit split path (multi-tile)
    out_s = jax.block_until_ready(
        context_guide_fusion(x0, x1, w1, w2, force_split=True, tile_hw=128))
    assert jnp.allclose(out_s, ref, atol=1e-5, rtol=1e-5), "split path mismatch"

    # bf16 activations end-to-end (gate math stays f32)
    x0b, x1b = x0.astype(jnp.bfloat16), x1.astype(jnp.bfloat16)
    out_b = jax.block_until_ready(
        context_guide_fusion(x0b, x1b, w1, w2, force_fused=True))
    ref_b = reference(x0b.astype(jnp.float32), x1b.astype(jnp.float32), w1, w2)
    assert out_b.dtype == jnp.bfloat16
    assert jnp.allclose(out_b.astype(jnp.float32), ref_b, atol=1e-1, rtol=1e-1), \
        "bf16 path mismatch"

    # --- Case 2: non-128-multiple spatial size (HW=240), no padding path. --
    B2, C2, H2, W2 = 1, 16, 12, 20
    ch2, hidden2 = 2 * C2, max(1, (2 * C2) // 16)
    k4, k5, k6, k7 = jax.random.split(jax.random.PRNGKey(1), 4)
    y0 = jax.random.normal(k4, (B2, C2, H2, W2), dtype=jnp.float32)
    y1 = jax.random.normal(k5, (B2, C2, H2, W2), dtype=jnp.float32)
    v1 = jax.random.normal(k6, (hidden2, ch2), dtype=jnp.float32) * 0.1
    v2 = jax.random.normal(k7, (ch2, hidden2), dtype=jnp.float32) * 0.1
    ref2 = reference(y0, y1, v1, v2)

    out2f = jax.block_until_ready(
        context_guide_fusion(y0, y1, v1, v2, force_fused=True))
    assert jnp.allclose(out2f, ref2, atol=1e-5, rtol=1e-5), "fused HW=240 mismatch"

    out2s = jax.block_until_ready(
        context_guide_fusion(y0, y1, v1, v2, force_split=True, tile_hw=128))
    assert jnp.allclose(out2s, ref2, atol=1e-5, rtol=1e-5), "split HW=240 mismatch"

    print("KERNEL_OK")
</pallas_src>

<mosaic_0001>
module attributes {stable_mosaic.version = 11 : i64} {
  func.func @cgfm_fused_kernel(%arg0: i32, %arg1: memref<1x32x256xf32, #tpu.memory_space<vmem>>, %arg2: memref<1x32x256xf32, #tpu.memory_space<vmem>>, %arg3: memref<4x64xf32, #tpu.memory_space<vmem>>, %arg4: memref<64x4xf32, #tpu.memory_space<vmem>>, %arg5: memref<1x2x32x256xf32, #tpu.memory_space<vmem>>) attributes {dimension_semantics = [#tpu.dimension_semantics<parallel>], iteration_bounds = array<i64: 2>, scalar_prefetch = 0 : i64, scratch_operands = 0 : i64, tpu.core_type = #tpu.core_type<tc>, window_params = [{transform_indices = @transform_0, window_bounds = array<i64: 1, 32, 256>}, {transform_indices = @transform_1, window_bounds = array<i64: 1, 32, 256>}, {pipeline_mode = #tpu.pipeline_mode<synchronous>, transform_indices = @transform_2, window_bounds = array<i64: 4, 64>}, {pipeline_mode = #tpu.pipeline_mode<synchronous>, transform_indices = @transform_3, window_bounds = array<i64: 64, 4>}, {transform_indices = @transform_4, window_bounds = array<i64: 1, 2, 32, 256>}]} {
    %c0 = arith.constant 0 : index
    %c0_0 = arith.constant 0 : index
    %c0_1 = arith.constant 0 : index
    %0 = vector.load %arg1[%c0, %c0_0, %c0_1] : memref<1x32x256xf32, #tpu.memory_space<vmem>>, vector<1x32x256xf32>
    %1 = vector.shape_cast %0 : vector<1x32x256xf32> to vector<32x256xf32>
    %c0_2 = arith.constant 0 : index
    %c0_3 = arith.constant 0 : index
    %c0_4 = arith.constant 0 : index
    %2 = vector.load %arg2[%c0_2, %c0_3, %c0_4] : memref<1x32x256xf32, #tpu.memory_space<vmem>>, vector<1x32x256xf32>
    %3 = vector.shape_cast %2 : vector<1x32x256xf32> to vector<32x256xf32>
    %cst = arith.constant 1.000000e+00 : f32
    %4 = vector.broadcast %cst : f32 to vector<256x1xf32>
    %cst_5 = arith.constant dense<0.000000e+00> : vector<32x1xf32>
    %5 = tpu.matmul %1, %4, %cst_5 {dimension_numbers = #tpu.dot_dimension_numbers<[1], [0], [0], [1], [0, 0, 1, 1], [], []>} : vector<32x256xf32>, vector<256x1xf32>, vector<32x1xf32> -> vector<32x1xf32>
    %cst_6 = arith.constant 3.906250e-03 : f32
    %6 = vector.broadcast %cst_6 : f32 to vector<32x1xf32>
    %7 = arith.mulf %5, %6 : vector<32x1xf32>
    %cst_7 = arith.constant dense<0.000000e+00> : vector<32x1xf32>
    %8 = tpu.matmul %3, %4, %cst_7 {dimension_numbers = #tpu.dot_dimension_numbers<[1], [0], [0], [1], [0, 0, 1, 1], [], []>} : vector<32x256xf32>, vector<256x1xf32>, vector<32x1xf32> -> vector<32x1xf32>
    %cst_8 = arith.constant 3.906250e-03 : f32
    %9 = vector.broadcast %cst_8 : f32 to vector<32x1xf32>
    %10 = arith.mulf %8, %9 : vector<32x1xf32>
    %11 = tpu.concatenate %7, %10 in 0 : vector<32x1xf32>, vector<32x1xf32> -> vector<64x1xf32>
    %c0_9 = arith.constant 0 : index
    %c0_10 = arith.constant 0 : index
    %12 = vector.load %arg3[%c0_9, %c0_10] : memref<4x64xf32, #tpu.memory_space<vmem>>, vector<4x64xf32>
    %cst_11 = arith.constant dense<0.000000e+00> : vector<4x1xf32>
    %13 = tpu.matmul %12, %11, %cst_11 {dimension_numbers = #tpu.dot_dimension_numbers<[1], [0], [0], [1], [0, 0, 1, 1], [], []>} : vector<4x64xf32>, vector<64x1xf32>, vector<4x1xf32> -> vector<4x1xf32>
    %cst_12 = arith.constant 0.000000e+00 : f32
    %14 = vector.broadcast %cst_12 : f32 to vector<4x1xf32>
    %15 = arith.maximumf %13, %14 : vector<4x1xf32>
    %c0_13 = arith.constant 0 : index
    %c0_14 = arith.constant 0 : index
    %16 = vector.load %arg4[%c0_13, %c0_14] : memref<64x4xf32, #tpu.memory_space<vmem>>, vector<64x4xf32>
    %cst_15 = arith.constant dense<0.000000e+00> : vector<64x1xf32>
    %17 = tpu.matmul %16, %15, %cst_15 {dimension_numbers = #tpu.dot_dimension_numbers<[1], [0], [0], [1], [0, 0, 1, 1], [], []>} : vector<64x4xf32>, vector<4x1xf32>, vector<64x1xf32> -> vector<64x1xf32>
    %18 = arith.negf %17 : vector<64x1xf32>
    %19 = math.exp %18 : vector<64x1xf32>
    %cst_16 = arith.constant 1.000000e+00 : f32
    %20 = vector.broadcast %cst_16 : f32 to vector<64x1xf32>
    %21 = arith.addf %20, %19 : vector<64x1xf32>
    %22 = arith.divf %20, %21 : vector<64x1xf32>
    %23 = vector.extract_strided_slice %22 {offsets = [0, 0], sizes = [32, 1], strides = [1, 1]} : vector<64x1xf32> to vector<32x1xf32>
    %24 = vector.extract_strided_slice %22 {offsets = [32, 0], sizes = [32, 1], strides = [1, 1]} : vector<64x1xf32> to vector<32x1xf32>
    %25 = vector.broadcast %24 : vector<32x1xf32> to vector<32x256xf32>
    %26 = arith.mulf %3, %25 : vector<32x256xf32>
    %27 = arith.mulf %3, %26 : vector<32x256xf32>
    %28 = arith.addf %1, %27 : vector<32x256xf32>
    %c0_17 = arith.constant 0 : index
    %c0_18 = arith.constant 0 : index
    %c0_19 = arith.constant 0 : index
    %c0_20 = arith.constant 0 : index
    %29 = vector.load %arg5[%c0_17, %c0_18, %c0_19, %c0_20] : memref<1x2x32x256xf32, #tpu.memory_space<vmem>>, vector<1x1x32x256xf32>
    %30 = vector.shape_cast %29 : vector<1x1x32x256xf32> to vector<32x256xf32>
    %31 = vector.shape_cast %28 : vector<32x256xf32> to vector<1x1x32x256xf32>
    tpu.vector_store %arg5[%c0_17, %c0_18, %c0_19, %c0_20], %31 {strides = array<i32>} : memref<1x2x32x256xf32, #tpu.memory_space<vmem>>, vector<1x1x32x256xf32>,
    %32 = vector.broadcast %23 : vector<32x1xf32> to vector<32x256xf32>
    %33 = arith.mulf %1, %32 : vector<32x256xf32>
    %34 = arith.mulf %1, %33 : vector<32x256xf32>
    %35 = arith.addf %3, %34 : vector<32x256xf32>
    %c0_21 = arith.constant 0 : index
    %c1 = arith.constant 1 : index
    %c0_22 = arith.constant 0 : index
    %c0_23 = arith.constant 0 : index
    %36 = vector.load %arg5[%c0_21, %c1, %c0_22, %c0_23] : memref<1x2x32x256xf32, #tpu.memory_space<vmem>>, vector<1x1x32x256xf32>
    %37 = vector.shape_cast %36 : vector<1x1x32x256xf32> to vector<32x256xf32>
    %38 = vector.shape_cast %35 : vector<32x256xf32> to vector<1x1x32x256xf32>
    tpu.vector_store %arg5[%c0_21, %c1, %c0_22, %c0_23], %38 {strides = array<i32>} : memref<1x2x32x256xf32, #tpu.memory_space<vmem>>, vector<1x1x32x256xf32>,
    return
  }
  func.func @transform_0(%arg0: i32) -> (i32, i32, i32) {
    %c0_i32 = arith.constant 0 : i32
    %c0_i32_0 = arith.constant 0 : i32
    %c0_i32_1 = arith.constant 0 : i32
    return %arg0, %c0_i32, %c0_i32_0 : i32, i32, i32
  }
  func.func @transform_1(%arg0: i32) -> (i32, i32, i32) {
    %c0_i32 = arith.constant 0 : i32
    %c0_i32_0 = arith.constant 0 : i32
    %c0_i32_1 = arith.constant 0 : i32
    return %arg0, %c0_i32, %c0_i32_0 : i32, i32, i32
  }
  func.func @transform_2(%arg0: i32) -> (i32, i32) {
    %c0_i32 = arith.constant 0 : i32
    %c0_i32_0 = arith.constant 0 : i32
    %c0_i32_1 = arith.constant 0 : i32
    return %c0_i32, %c0_i32_0 : i32, i32
  }
  func.func @transform_3(%arg0: i32) -> (i32, i32) {
    %c0_i32 = arith.constant 0 : i32
    %c0_i32_0 = arith.constant 0 : i32
    %c0_i32_1 = arith.constant 0 : i32
    return %c0_i32, %c0_i32_0 : i32, i32
  }
  func.func @transform_4(%arg0: i32) -> (i32, i32, i32, i32) {
    %c0_i32 = arith.constant 0 : i32
    %c0_i32_0 = arith.constant 0 : i32
    %c0_i32_1 = arith.constant 0 : i32
    %c0_i32_2 = arith.constant 0 : i32
    return %arg0, %c0_i32, %c0_i32_0, %c0_i32_1 : i32, i32, i32, i32
  }
}

</mosaic_0001>

<bundles_post_ra>
// kernel: tpu_custom_call.1
= control target key start
LH: loop header
LB: loop body
LE: loop exit
PB: predicated region body
PF: predicated region fallthrough
CT: control target
= control target key end

     0   :  { %9 = vsyncpa [#allocation3], 0  ;;  %s1820_s0 = inlined_call_operand.hbm [shape: f32[2,32,256], index: 0, kind: input, shape index: {}]   ;;  %s1821_s1 = inlined_call_operand.hbm [shape: f32[2,32,256], index: 1, kind: input, shape index: {}]   ;;  %s1822_s2 = inlined_call_operand.vmem [shape: f32[4,64], index: 2, kind: input, shape index: {}]   ;;  %s1823_s3 = inlined_call_operand.vmem [shape: f32[64,4], index: 3, kind: input, shape index: {}]   ;;  %s1824_s4 = inlined_call_operand.hbm [shape: f32[2,2,32,256], index: 4, kind: output, shape index: {}]  }
   0x1   :  { %11 = vsyncpa [#allocation3 + $0x1], 0 }
   0x2   :  { %12 = vsyncpa [#allocation6], 0 }
   0x3   :  { %14 = vsyncpa [#allocation6 + $0x1], 0 }
   0x4   :  { %15 = vsyncpa [#allocation4], 0 }
   0x5   :  { %17 = vsyncpa [#allocation4 + $0x1], 0  ;;  %s1426_s15 = smov 0   ;;  %s1428_s16 = smov 0  }
   0x6   :  { %s1430_s17 = smov 0   ;;  %s1432_s18 = smov 0  }
   0x7 LB: > { %s1447_s19 = sadd.s32 4294967295, %s1387_s18   ;;  %s931_s20 = sadd.s32 4294967294, %s1387_s18   ;;  %s1387_s18 = sphi %s1432_s18, %s1840_s18   ;;  %s1383_s17 = sphi %s1430_s17, %s1839_s17   ;;  %s1379_s16 = sphi %s1428_s16, %s1838_s16   ;;  %s1375_s15 = sphi %s1426_s15, %s1837_s15  }
   0x8   : > { %s1451_s21 = sadd.s32 1, %s1387_s18   ;;  %s30_s22 = sadd.s32 1, %s1383_s17 }
   0x9   : > { %s27_s23 = ssub.s32 %s1387_s18, %s1451_s21  ;;  %p37_p0 = scmp.ne.s32.totalorder %s1383_s17, %s1379_s16 }
   0xa   : > { %p28_p1 = scmp.eq.s32.totalorder %s27_s23, 0  ;;  %p38_p2 = scmp.eq.s32.totalorder %s1387_s18, 0 }
   0xb   : > { %p43_p3 = scmp.ne.s32.totalorder %s1379_s16, %s1375_s15  ;;  %p44_p4 = scmp.eq.s32.totalorder %s1447_s19, 0 }
   0xc   : > { %s1463_s24 = scalar_select %p28_p1, %s1383_s17, %s30_s22  }
   0xd   : > { %p1465_p5 = por %p38_p2, %p37_p0  ;;  %p1469_p6 = por %p44_p4, %p43_p3 }
   0xe   : > { %p135_p7 = scmp.eq.s32.totalorder %s1447_s19, 1  ;;  %p141_p8 = scmp.eq.s32.totalorder %s931_s20, 1 }
   0xf   : > { %s1828_s26 = scalar_select %p1469_p6, 1, 0 }
  0x10   : > { %p1180_p10 = scmp.lt.s32.totalorder %s1387_s18, 2  ;;  %p1476_p11 = por %p135_p7, %p37_p0 }
  0x11   : > { %p1480_p12 = por %p141_p8, %p43_p3  ;;  %s1485_s29 = sand.u32 1, %s1383_s17  }
  0x12   : > { %s1829_s27 = scalar_select %p1476_p11, 1, 0 }
  0x13   : > { %s1830_s28 = scalar_select %p1480_p12, 1, 0 }
  0x14   : > { %s975_s30 = sshll.u32 %s1387_s18, 10  ;;  %s934_s5 = sshll.u32 %s1485_s29, 6 }
  0x15   : > { %s1494_s8 = scalar_lea.hbm %s1820_s0, %s975_s30  ;;  %s171_s9 = scalar_lea.vmem [#allocation2], %s934_s5 }
  0x16   : > { %s178_s10 = sshll.u32 %s171_s9, 4  ;;  %p1500_p13 = pnand %p1180_p10, %p1465_p5  ;;  %s1504_s10 = int_to_ptr.vmem [resolvable:$true] %s178_s10 }
  0x17   : > { %s168_s12 = scalar_lea.sflag [#allocation3], %s1485_s29  ;;  %s1257_s13 = scalar_lea.hbm %s1494_s8, 1024 }
  0x18   : > { %p1258_p0 = scmp.ne.s32.totalorder %s1494_s8, %s1257_s13  ;;  %p1259_p1 = pneg %p1500_p13 }
  0x19   : > { %s1262_s22 = scalar_lea.hbm %s1820_s0, 2048  ;;  %p1263_p4 = scmp.lt.u32.totalorder %s1494_s8, %s1820_s0 }
  0x1a   : > { %p1260_p2 = pnand %p1259_p1, %p1258_p0  ;;  %p1264_p5 = scmp.lt.u32.totalorder %s1262_s22, %s1257_s13 }
  0x1b   : > { %p1266_p8 = scmp.lt.u32.totalorder %s1257_s13, %s1494_s8 }
  0x1c   : > { %p1261_p3 = pneg %p1260_p2  ;;  %p1265_p7 = por %p1264_p5, %p1263_p4 }
  0x1e   : > { %p1267_p10 = por %p1266_p8, %p1265_p7 }
  0x20   : > { %p1268_p9 = pnand %p1267_p10, %p1261_p3 }
  0x22   : > { %1271 = shalt.err (!%p1268_p9)
}
  0x23   : > { %s1272_s6 = scalar_lea.vmem %s1504_s10, 1024  ;;  %s1389_s7 = smov [#allocation2]  }
  0x24   : > { %p1273_p0 = scmp.ne.s32.totalorder %s1504_s10, %s1272_s6  ;;  %s1277_s9 = sshll.u32 %s1389_s7, 4  ;;  %s1278_s9 = int_to_ptr.vmem [resolvable:$false] %s1277_s9 }
  0x25   : > { %s1279_s14 = scalar_lea.vmem %s1278_s9, 2048  ;;  %p1280_p11 = scmp.lt.s32.totalorder %s1504_s10, %s1278_s9 }
  0x26   : > { %p1275_p2 = pnand %p1273_p0, %p1259_p1  ;;  %p1281_p4 = scmp.lt.s32.totalorder %s1279_s14, %s1272_s6 }
  0x28   : > { %p1276_p12 = pneg %p1275_p2  ;;  %p1282_p5 = por %p1281_p4, %p1280_p11 }
  0x2a   : > { %p1283_p7 = pnand %p1282_p5, %p1276_p12 }
  0x2c   : > { %1286 = shalt.err (!%p1283_p7)
}
  0x2d   : > { %s1390_s13 = smov 256   ;;  %s1391_s20 = smov 16  }
  0x2e   : > { %1172 = dma.hbm_to_vmem [thread:$0]  (!%p1500_p13), %s1494_s8, 1024, %s1504_s10, %s168_s12, %s1390_s13, %s1390_s13, %s1391_s20  }
  0x2f   : > { %p940_p9 = scmp.ge.s32.totalorder %s1387_s18, 1  ;;  %p207_p11 = scmp.lt.s32.totalorder %s1387_s18, 3 }
  0x30   : > { %s1548_s6 = scalar_lea.hbm %s1821_s1, %s975_s30  ;;  %s192_s7 = scalar_lea.vmem [#allocation5], %s934_s5 }
  0x31   : > { %p1539_p12 = pnand %p940_p9, %p207_p11  ;;  %s199_s9 = sshll.u32 %s192_s7, 4  ;;  %s1552_s9 = int_to_ptr.vmem [resolvable:$true] %s199_s9 }
  0x32   : > { %s189_s8 = scalar_lea.sflag [#allocation6], %s1485_s29  ;;  %s1287_s10 = scalar_lea.hbm %s1548_s6, 1024 }
  0x33   : > { %p1288_p3 = scmp.ne.s32.totalorder %s1548_s6, %s1287_s10  ;;  %s1292_s30 = scalar_lea.hbm %s1821_s1, 2048 }
  0x34   : > { %p1293_p0 = scmp.lt.u32.totalorder %s1548_s6, %s1821_s1  ;;  %p1294_p2 = scmp.lt.u32.totalorder %s1292_s30, %s1287_s10 }
  0x35   : > { %p1290_p8 = pnand %p1288_p3, %p1259_p1  ;;  %p1296_p5 = scmp.lt.u32.totalorder %s1287_s10, %s1548_s6 }
  0x36   : > { %p1295_p4 = por %p1294_p2, %p1293_p0 }
  0x37   : > { %p1291_p10 = pneg %p1290_p8 }
  0x38   : > { %p1297_p7 = por %p1296_p5, %p1295_p4 }
  0x3a   : > { %p1298_p9 = pnand %p1297_p7, %p1291_p10 }
  0x3c   : > { %1301 = shalt.err (!%p1298_p9)
}
  0x3d   : > { %s1302_s5 = scalar_lea.vmem %s1552_s9, 1024  ;;  %s1392_s7 = smov [#allocation5]  }
  0x3e   : > { %p1303_p11 = scmp.ne.s32.totalorder %s1552_s9, %s1302_s5  ;;  %s1307_s12 = sshll.u32 %s1392_s7, 4  ;;  %s1308_s12 = int_to_ptr.vmem [resolvable:$false] %s1307_s12 }
  0x3f   : > { %s1309_s14 = scalar_lea.vmem %s1308_s12, 2048  ;;  %p1310_p6 = scmp.lt.s32.totalorder %s1552_s9, %s1308_s12 }
  0x40   : > { %p1305_p3 = pnand %p1303_p11, %p1259_p1  ;;  %p1311_p0 = scmp.lt.s32.totalorder %s1309_s14, %s1302_s5 }
  0x42   : > { %p1306_p8 = pneg %p1305_p3  ;;  %p1312_p2 = por %p1311_p0, %p1310_p6 }
  0x44   : > { %p1313_p4 = pnand %p1312_p2, %p1306_p8 }
  0x46   : > { %1316 = shalt.err (!%p1313_p4)
}
  0x47   : > { %1175 = dma.hbm_to_vmem [thread:$0]  (!%p1500_p13), %s1548_s6, 1024, %s1552_s9, %s189_s8, %s1390_s13, %s1390_s13, %s1391_s20  }
  0x48   : > { %211 = sbr.rel (%p1539_p12) target bundleno = 976 (0x3d0), region = 36  ;;  %s1586_s10 = sand.u32 (!%p1539_p12), 1, %s1379_s16  }
  0x49   : > { %s941_s30 = sshll.u32 (!%p1539_p12), %s1586_s10, 6  ;;  %s214_s23 = scalar_lea.sflag (!%p1539_p12), [#allocation3], %s1586_s10 }
  0x4a   : > { %s1590_s11 = scalar_lea.vmem (!%p1539_p12), [#allocation2], %s941_s30  ;;  %p1833_p6 = scmp.ne.s32.totalorder (!%p1539_p12), %s1828_s26, 0 }
  0x4f   : > { %1362 = dma.done.wait (%p1833_p6), %s214_s23, 1024  }
  0x50   : > { %1364 = vsyncadd (%p1833_p6), %s214_s23, 4294966272  ;;  %s223_s29 = scalar_lea.sflag [#allocation6], %s1586_s10  ;;  %s1597_s13 = scalar_lea.vmem [#allocation5], %s941_s30 }
  0x51   : > { %1366 = dma.done.wait (%p1833_p6), %s223_s29, 1024  }
  0x52   : > { %1368 = vsyncadd (%p1833_p6), %s223_s29, 4294966272  ;;  %v1393_v0 = vmov 1.0|1.0   ;;  %v1604_v1 = vld [vmem:[%s1590_s11 + $0x8] sm:$0xff]  ;;  %v1612_v3 = vld [vmem:[%s1590_s11] sm:$0xff]  ;;  %v1394_v17 = vmov 0.0|0.0  }
  0x53   : > { %1117 = vmatprep.subr.bf16.mxu0 %v1393_v0  ;;  %1133 = vmatprep.subr.bf16.mxu1 %v1393_v0  ;;  %v1607_v2 = vld [vmem:[%s1597_s13 + $0x8] sm:$0xff]  ;;  %v1615_v4 = vld [vmem:[%s1597_s13] sm:$0xff]  ;;  %v1618_v5 = vld [vmem:[%s1590_s11 + $0x18] sm:$0xff]  ;;  %vm1395_vm0 = vmmov 0   ;;  %v1396_v18 = vmov 0.0   ;;  %vm451_vm1 = vcmask 523264  }
  0x54   : > { %1118 = vmatpush3.bf16.msra.mxu0 %v1393_v0  ;;  %1134 = vmatpush3.bf16.msra.mxu1 %v1393_v0  ;;  %v1621_v6 = vld [vmem:[%s1597_s13 + $0x18] sm:$0xff]  ;;  %v1627_v7 = vld [vmem:[%s1590_s11 + $0x10] sm:$0xff]  ;;  %v1634_v9 = vld [vmem:[%s1590_s11 + $0x28] sm:$0xff]  ;;  %vm534_vm2 = vcmask 31744   ;;  %vm559_vm3 = vcmask 1043456   ;;  %s943_s22 = sshll.u32 %s1586_s10, 7 }
  0x55   : > { %1119 = vmatprep.subr.bf16.mxu0 %v1393_v0  ;;  %1135 = vmatprep.subr.bf16.mxu1 %v1393_v0  ;;  %v1631_v8 = vld [vmem:[%s1597_s13 + $0x10] sm:$0xff]  ;;  %v1637_v10 = vld [vmem:[%s1597_s13 + $0x28] sm:$0xff]  ;;  %v1643_v11 = vld [vmem:[%s1590_s11 + $0x20] sm:$0xff]  ;;  %s1717_s6 = scalar_lea.vmem [#allocation7], %s943_s22  ;;  %s977_s9 = sshll.u32 %s1447_s19, 11 }
  0x56   : > { %336 = vmatprep.mubr.f32.mxu0 %v1604_v1  ;;  %425 = vmatprep.mubr.f32.mxu1 %v1607_v2  ;;  %v1647_v12 = vld [vmem:[%s1597_s13 + $0x20] sm:$0xff]  ;;  %v1650_v13 = vld [vmem:[%s1590_s11 + $0x38] sm:$0xff]  ;;  %v1659_v15 = vld [vmem:[%s1590_s11 + $0x30] sm:$0xff]  ;;  %s835_s8 = sshll.u32 %s1717_s6, 4  ;;  %s1770_s7 = scalar_lea.hbm %s1824_s4, %s977_s9  ;;  %s1772_s8 = int_to_ptr.vmem [resolvable:$true] %s835_s8 }
  0x57   : > { %v1653_v14 = vld [vmem:[%s1597_s13 + $0x38] sm:$0xff]  ;;  %v1663_v16 = vld [vmem:[%s1597_s13 + $0x30] sm:$0xff]  ;;  %v450_v55 = vld [vmem:[%s1822_s2] sm:$0xf]  ;;  %s822_s19 = scalar_lea.sflag [#allocation4], %s1586_s10  ;;  %s1317_s12 = scalar_lea.vmem %s1772_s8, 2048 }
  0x58   : > { %1120 = vmatpush3.bf16.msra.mxu0 %v1393_v0  ;;  %1136 = vmatpush3.bf16.msra.mxu1 %v1393_v0  ;;  %v528_v56 = vld [vmem:[%s1823_s3 + $0x10] sm:$0xff]  ;;  %v526_v57 = vld [vmem:[%s1823_s3] sm:$0xff]  ;;  %v529_v61 = vld [vmem:[%s1823_s3 + $0x18] sm:$0xff]  ;;  %p1318_p13 = scmp.ne.s32.totalorder %s1772_s8, %s1317_s12  ;;  %p1834_p1 = scmp.ne.s32.totalorder %s1829_s27, 0 }
  0x59   : > { %1121 = vmatprep.subr.bf16.mxu0 %v1393_v0  ;;  %1137 = vmatprep.subr.bf16.mxu1 %v1393_v0  ;;  %v527_v62 = vld [vmem:[%s1823_s3 + $0x8] sm:$0xff]  ;;  %v530_v63 = vld [vmem:[%s1823_s3 + $0x20] sm:$0xff]  ;;  %s1398_s14 = smov [#allocation7]  }
  0x5a   : > { %p1319_p12 = pnand %p1318_p13, %p1834_p1  ;;  %s1321_s30 = sshll.u32 %s1398_s14, 4  ;;  %s1322_s30 = int_to_ptr.vmem [resolvable:$false] %s1321_s30 }
  0x5b   : > { %s1323_s23 = scalar_lea.vmem %s1322_s30, 4096  ;;  %p1324_p5 = scmp.lt.s32.totalorder %s1772_s8, %s1322_s30 }
  0x5c   : > { %1122 = vmatpush3.bf16.msra.mxu0 %v1393_v0  ;;  %1138 = vmatpush3.bf16.msra.mxu1 %v1393_v0  ;;  %p1320_p10 = pneg %p1319_p12  ;;  %p1325_p7 = scmp.lt.s32.totalorder %s1323_s23, %s1317_s12 }
  0x5d   : > { %1123 = vmatprep.subr.bf16.mxu0 %v1393_v0  ;;  %1139 = vmatprep.subr.bf16.mxu1 %v1393_v0 }
  0x5e   : > { %p1326_p9 = por %p1325_p7, %p1324_p5 }
  0x60   : > { %1124 = vmatpush3.bf16.msra.mxu0 %v1393_v0  ;;  %1140 = vmatpush3.bf16.msra.mxu1 %v1393_v0  ;;  %p1327_p11 = pnand %p1326_p9, %p1320_p10 }
  0x61   : > { %1125 = vmatprep.subr.bf16.mxu0 %v1393_v0  ;;  %1141 = vmatprep.subr.bf16.mxu1 %v1393_v0 }
  0x64   : > { %1126 = vmatpush3.bf16.msra.mxu0 %v1393_v0  ;;  %1142 = vmatpush3.bf16.msra.mxu1 %v1393_v0 }
  0x65   : > { %1127 = vmatprep.subr.bf16.mxu0 %v1393_v0  ;;  %1143 = vmatprep.subr.bf16.mxu1 %v1393_v0 }
  0x68   : > { %1128 = vmatpush3.bf16.msra.mxu0 %v1393_v0  ;;  %1144 = vmatpush3.bf16.msra.mxu1 %v1393_v0 }
  0x69   : > { %1129 = vmatprep.subr.bf16.mxu0 %v1393_v0  ;;  %1145 = vmatprep.subr.bf16.mxu1 %v1393_v0 }
  0x6c   : > { %1130 = vmatpush3.bf16.msra.mxu0 %v1393_v0  ;;  %1146 = vmatpush3.bf16.msra.mxu1 %v1393_v0 }
  0x6d   : > { %1131 = vmatprep.subr.bf16.mxu0 %v1393_v0  ;;  %1147 = vmatprep.subr.bf16.mxu1 %v1393_v0 }
  0x70   : > { %1132 = vmatpush3.bf16.msra.mxu0 %v1393_v0  ;;  %1148 = vmatpush3.bf16.msra.mxu1 %v1393_v0  ;;  %v531_v0 = vld [vmem:[%s1823_s3 + $0x28] sm:$0xff] }
  0x71   : > { %1149 = vmatprep.subr.bf16.mxu0 %v1394_v17 }
  0x73   : > { %337 = vmatmul.mubr.f32.vlgmr.msra.gmra.mrb[0].mxu0 %v1612_v3  ;;  %426 = vmatmul.mubr.f32.vlgmr.msra.gmra.mrb[0].mxu1 %v1615_v4 }
  0x74   : > { %341 = vmatprep.mubr.f32.mxu0 %v1618_v5  ;;  %430 = vmatprep.mubr.f32.mxu1 %v1621_v6 }
  0x77   : > { %342 = vmatmul.mubr.f32.gmra.mrb[2].mxu0 %v1627_v7  ;;  %431 = vmatmul.mubr.f32.gmra.mrb[2].mxu1 %v1631_v8 }
  0x78   : > { %346 = vmatprep.mubr.f32.mxu0 %v1634_v9  ;;  %435 = vmatprep.mubr.f32.mxu1 %v1637_v10 }
  0x7b   : > { %347 = vmatmul.mubr.f32.gmra.mrb[4].mxu0 %v1643_v11  ;;  %436 = vmatmul.mubr.f32.gmra.mrb[4].mxu1 %v1647_v12 }
  0x7c   : > { %351 = vmatprep.mubr.f32.mxu0 %v1650_v13  ;;  %440 = vmatprep.mubr.f32.mxu1 %v1653_v14 }
  0x7f   : > { %352 = vmatmul.mubr.f32.gmra.mrb[6].mxu0 %v1659_v15  ;;  %441 = vmatmul.mubr.f32.gmra.mrb[6].mxu1 %v1663_v16 }
  0x80   : > { %1100 = vmatprep.mubr.msk.f32.mxu0 %vm1395_vm0, %v1396_v18  ;;  %1108 = vmatprep.mubr.msk.f32.mxu1 %vm534_vm2, %v528_v56  ;;  %v533_v18 = vld [vmem:[%s1823_s3 + $0x38] sm:$0xff] }
 0x146   : > { %v1010_v19 = vpop.f32.mrb[0].mxu0  ;;  %v1054_v20 = vpop.f32.mrb[0].mxu1 }
 0x147   : > { %v1011_v21 = vpop.f32.mrb[1].mxu0  ;;  %v1055_v22 = vpop.f32.mrb[1].mxu1 }
 0x148   : > { %v1012_v23 = vadd.f32 %v1011_v21, %v1010_v19  ;;  %v1056_v24 = vadd.f32 %v1055_v22, %v1054_v20  ;;  %v1397_v19 = vmov 0  }
 0x149   : > { %1224 = vset.pattern.permute.xlu0 %v1397_v19  ;;  %1223 = vset.pattern.permute.xlu1 %v1397_v19 }
 0x14a   : > { %v1013_v25 = vpop.f32.mrb[2].mxu0  ;;  %v1057_v26 = vpop.f32.mrb[2].mxu1  ;;  %v446_v30 = vmul.f32 0.00390625, %v1056_v24  ;;  %v357_v32 = vmul.f32 0.00390625, %v1012_v23 }
 0x14b   : > { %v1014_v27 = vpop.f32.mrb[3].mxu0  ;;  %v1058_v28 = vpop.f32.mrb[3].mxu1 }
 0x14c   : > { %v1015_v29 = vadd.f32 %v1014_v27, %v1013_v25  ;;  %v1059_v31 = vadd.f32 %v1058_v28, %v1057_v26 }
 0x14e   : > { %v358_v33 = vmul.f32 0.00390625, %v1015_v29  ;;  %v1016_v34 = vpop.f32.mrb[4].mxu0  ;;  %v447_v35 = vmul.f32 0.00390625, %v1059_v31  ;;  %v1060_v36 = vpop.f32.mrb[4].mxu1 }
 0x14f   : > { %v1017_v37 = vpop.f32.mrb[5].mxu0  ;;  %v1061_v38 = vpop.f32.mrb[5].mxu1 }
 0x150   : > { %v1150_v39 = vpack.c.bf16 %v358_v33, %v357_v32  ;;  %v1156_v40 = vpack.c.bf16 %v447_v35, %v446_v30  ;;  %v1018_v41 = vadd.f32 %v1017_v37, %v1016_v34  ;;  %v1062_v42 = vadd.f32 %v1061_v38, %v1060_v36 }
 0x152   : > { %v1019_v43 = vpop.f32.mrb[6].mxu0  ;;  %1151 = vmatpush3.bf16.msra.mxu0 %v1150_v39  ;;  %v1063_v44 = vpop.f32.mrb[6].mxu1  ;;  %v448_v48 = vmul.f32 0.00390625, %v1062_v42  ;;  %v359_v50 = vmul.f32 0.00390625, %v1018_v41 }
 0x153   : > { %v1020_v45 = vpop.f32.mrb[7].mxu0  ;;  %v1064_v46 = vpop.f32.mrb[7].mxu1  ;;  %1152 = vmatprep.subr.bf16.mxu0 %v1394_v17 }
 0x154   : > { %v1021_v47 = vadd.f32 %v1020_v45, %v1019_v43  ;;  %v1065_v49 = vadd.f32 %v1064_v46, %v1063_v44 }
 0x156   : > { %v360_v51 = vmul.f32 0.00390625, %v1021_v47  ;;  %v449_v52 = vmul.f32 0.00390625, %v1065_v49 }
 0x158   : > { %v1153_v53 = vpack.c.bf16 %v360_v51, %v359_v50  ;;  %v1159_v54 = vpack.c.bf16 %v449_v52, %v448_v48 }
 0x15a   : > { %1154 = vmatpush3.bf16.msra.mxu0 %v1153_v53 }
 0x15b   : > { %1155 = vmatprep.subr.bf16.mxu0 %v1394_v17 }
 0x15e   : > { %1157 = vmatpush3.bf16.msra.mxu0 %v1156_v40 }
 0x15f   : > { %1158 = vmatprep.subr.bf16.mxu0 %v1394_v17  ;;  %v532_v17 = vld [vmem:[%s1823_s3 + $0x30] sm:$0xff] }
 0x162   : > { %1160 = vmatpush3.bf16.msra.mxu0 %v1159_v54 }
 0x165   : > { %1101 = vmatmul.mubr.msk.f32.vlgmr.msra.gmra.mrb[8].mxu0 %vm451_vm1, %v450_v55 }
 0x166   : > { %1105 = vmatprep.mubr.msk.f32.mxu0 %vm534_vm2, %v526_v57 }
 0x238   : > { %v521_v58 = vpop.f32.mrb[8].mxu0 }
 0x239   : > { %v525_v59 = vmax.f32 %v521_v58, 0.0  ;;  %v1102_v60 = vpop.f32.mrb[9].mxu0 }
 0x23b   : > { %1103 = vmatprep.subr.msk.mxu0 %vm559_vm3, %v525_v59  ;;  %1161 = vmatprep.subr.msk.mxu1 %vm559_vm3, %v525_v59 }
 0x23c   : > { %1104 = vmatpush3.msk.msra.mxu0 %vm559_vm3, %v525_v59  ;;  %1162 = vmatpush3.msk.msra.mxu1 %vm559_vm3, %v525_v59 }
 0x23d   : > { %1109 = vmatmul.mubr.msk.f32.vlgmr.msra.gmra.mrb[8].mxu1 %vm534_vm2, %v529_v61  ;;  %1106 = vmatmul.mubr.msk.f32.vlgmr.msra.gmra.mrb[10].mxu0 %vm534_vm2, %v527_v62 }
 0x23e   : > { %1111 = vmatprep.mubr.msk.f32.mxu1 %vm534_vm2, %v530_v63 }
 0x241   : > { %1112 = vmatmul.mubr.msk.f32.gmra.mrb[10].mxu1 %vm534_vm2, %v531_v0 }
 0x242   : > { %1114 = vmatprep.mubr.msk.f32.mxu1 %vm534_vm2, %v532_v17 }
 0x245   : > { %1115 = vmatmul.mubr.msk.f32.gmra.mrb[12].mxu1 %vm534_vm2, %v533_v18 }
 0x310   : > { %v1107_v20 = vpop.f32.mrb[10].mxu0  ;;  %v1110_v21 = vpop.f32.mrb[8].mxu1 }
 0x311   : > { %v955_v22 = vmul.f32 -1.442695, %v1107_v20  ;;  %v629_v23 = vpop.f32.mrb[11].mxu0  ;;  %v639_v24 = vpop.f32.mrb[9].mxu1  ;;  %v957_v35 = vmul.f32 -1.442695, %v1110_v21 }
 0x312   : > { %v954_v25 = vmul.f32 -1.442695, %v629_v23  ;;  %v956_v29 = vmul.f32 -1.442695, %v639_v24 }
 0x313   : > { %1225 = vpow2.f32 %v955_v22 }
 0x314   : > { %1227 = vpow2.f32 %v954_v25  ;;  %v1113_v26 = vpop.f32.mrb[10].mxu1 }
 0x315   : > { %v959_v27 = vmul.f32 -1.442695, %v1113_v26  ;;  %v649_v28 = vpop.f32.mrb[11].mxu1 }
 0x316   : > { %v958_v30 = vmul.f32 -1.442695, %v649_v28 }
 0x317   : > { %1229 = vpow2.f32 %v959_v27 }
 0x318   : > { %1231 = vpow2.f32 %v958_v30  ;;  %v1116_v31 = vpop.f32.mrb[12].mxu1 }
 0x319   : > { %v961_v32 = vmul.f32 -1.442695, %v1116_v31  ;;  %v659_v33 = vpop.f32.mrb[13].mxu1  ;;  %1233 = vpow2.f32 %v956_v29 }
 0x31a   : > { %v960_v34 = vmul.f32 -1.442695, %v659_v33 }
 0x31b   : > { %1235 = vpow2.f32 %v961_v32 }
 0x31c   : > { %1237 = vpow2.f32 %v960_v34 }
 0x31d   : > { %v1226_v36 = vpop.eup %1225  ;;  %1239 = vpow2.f32 %v957_v35 }
 0x31e   : > { %v1228_v37 = vpop.eup %1227  ;;  %v693_v38 = vadd.f32 1.0, %v1226_v36 }
 0x31f   : > { %v692_v39 = vadd.f32 1.0, %v1228_v37 }
 0x320   : > { %1241 = vrcp.f32 %v693_v38 }
 0x321   : > { %v1230_v40 = vpop.eup %1229  ;;  %1243 = vrcp.f32 %v692_v39 }
 0x322   : > { %v1232_v41 = vpop.eup %1231  ;;  %v697_v42 = vadd.f32 1.0, %v1230_v40 }
 0x323   : > { %v1234_v43 = vpop.eup %1233  ;;  %v696_v45 = vadd.f32 1.0, %v1232_v41 }
 0x324   : > { %1245 = vrcp.f32 %v697_v42  ;;  %v694_v50 = vadd.f32 1.0, %v1234_v43 }
 0x325   : > { %v1236_v44 = vpop.eup %1235 }
 0x326   : > { %v1238_v46 = vpop.eup %1237  ;;  %v699_v47 = vadd.f32 1.0, %v1236_v44 }
 0x327   : > { %v698_v48 = vadd.f32 1.0, %v1238_v46  ;;  %v1240_v49 = vpop.eup %1239 }
 0x328   : > { %1247 = vrcp.f32 %v699_v47  ;;  %v695_v53 = vadd.f32 1.0, %v1240_v49 }
 0x329   : > { %1249 = vrcp.f32 %v696_v45 }
 0x32a   : > { %v1242_v51 = vpop.eup %1241  ;;  %1251 = vrcp.f32 %v698_v48 }
 0x32b   : > { %v1244_v52 = vpop.eup %1243  ;;  %775 = vperm.xlu1 %1223, %v1242_v51   ;;  %1253 = vrcp.f32 %v694_v50 }
 0x32c   : > { %770 = vperm.xlu0 %1224, %v1244_v52   ;;  %1255 = vrcp.f32 %v695_v53 }
 0x32e   : > { %v1246_v54 = vpop.eup %1245 }
 0x330   : > { %723 = vperm.xlu0 %1224, %v1246_v54  }
 0x332   : > { %v1248_v55 = vpop.eup %1247 }
 0x333   : > { %v1250_v56 = vpop.eup %1249  ;;  %733 = vperm.xlu1 %1223, %v1248_v55  }
 0x334   : > { %718 = vperm.xlu0 %1224, %v1250_v56   ;;  %v1252_v57 = vpop.eup %1251 }
 0x335   : > { %v1254_v58 = vpop.eup %1253 }
 0x336   : > { %v1256_v59 = vpop.eup %1255 }
 0x337   : > { %728 = vperm.xlu1 %1223, %v1252_v57  }
 0x338   : > { %780 = vperm.xlu0 %1224, %v1254_v58  }
 0x33b   : > { %785 = vperm.xlu1 %1223, %v1256_v59  }
 0x3aa   : > { %v776_v60 = vpop.permute.xlu1 %775 }
 0x3ab   : > { %v771_v61 = vpop.permute.xlu0 %770  ;;  %v790_v62 = vmul.f32 %v776_v60, %v1627_v7  ;;  %v791_v63 = vmul.f32 %v776_v60, %v1618_v5 }
 0x3ac   : > { %v788_v0 = vmul.f32 %v771_v61, %v1612_v3  ;;  %v789_v17 = vmul.f32 %v771_v61, %v1604_v1 }
 0x3ad   : > { %v798_v18 = vmul.f32 %v790_v62, %v1627_v7  ;;  %v799_v19 = vmul.f32 %v791_v63, %v1618_v5 }
 0x3ae   : > { %v796_v20 = vmul.f32 %v788_v0, %v1612_v3  ;;  %v797_v21 = vmul.f32 %v789_v17, %v1604_v1 }
 0x3af   : > { %v806_v22 = vadd.f32 %v798_v18, %v1631_v8  ;;  %v807_v23 = vadd.f32 %v799_v19, %v1621_v6  ;;  %v724_v24 = vpop.permute.xlu0 %723 }
 0x3b0   : > { %v804_v25 = vadd.f32 %v796_v20, %v1615_v4  ;;  %v805_v26 = vadd.f32 %v797_v21, %v1607_v2  ;;  %v738_v27 = vmul.f32 %v724_v24, %v1631_v8  ;;  %v739_v28 = vmul.f32 %v724_v24, %v1621_v6 }
 0x3b1   : > { %964 = vst [vmem:[%s1717_s6 + $0x50] sm:$0xff] %v806_v22  ;;  %965 = vst [vmem:[%s1717_s6 + $0x58] sm:$0xff] %v807_v23 }
 0x3b2   : > { %962 = vst [vmem:[%s1717_s6 + $0x40] sm:$0xff] %v804_v25  ;;  %963 = vst [vmem:[%s1717_s6 + $0x48] sm:$0xff] %v805_v26  ;;  %v746_v29 = vmul.f32 %v738_v27, %v1631_v8  ;;  %v747_v30 = vmul.f32 %v739_v28, %v1621_v6  ;;  %v734_v31 = vpop.permute.xlu1 %733 }
 0x3b3   : > { %v742_v32 = vmul.f32 %v734_v31, %v1663_v16  ;;  %v743_v33 = vmul.f32 %v734_v31, %v1653_v14  ;;  %v719_v34 = vpop.permute.xlu0 %718 }
 0x3b4   : > { %v754_v35 = vadd.f32 %v746_v29, %v1627_v7  ;;  %v755_v36 = vadd.f32 %v747_v30, %v1618_v5  ;;  %v736_v37 = vmul.f32 %v719_v34, %v1615_v4  ;;  %v737_v38 = vmul.f32 %v719_v34, %v1607_v2 }
 0x3b5   : > { %v750_v39 = vmul.f32 %v742_v32, %v1663_v16  ;;  %v751_v8 = vmul.f32 %v743_v33, %v1653_v14 }
 0x3b6   : > { %762 = vst [vmem:[%s1717_s6 + $0x10] sm:$0xff] %v754_v35  ;;  %763 = vst [vmem:[%s1717_s6 + $0x18] sm:$0xff] %v755_v36  ;;  %v744_v6 = vmul.f32 %v736_v37, %v1615_v4  ;;  %v745_v40 = vmul.f32 %v737_v38, %v1607_v2  ;;  %v729_v7 = vpop.permute.xlu1 %728 }
 0x3b7   : > { %v758_v5 = vadd.f32 %v750_v39, %v1659_v15  ;;  %v759_v41 = vadd.f32 %v751_v8, %v1650_v13  ;;  %v740_v42 = vmul.f32 %v729_v7, %v1647_v12  ;;  %v741_v43 = vmul.f32 %v729_v7, %v1637_v10  ;;  %v781_v44 = vpop.permute.xlu0 %780 }
 0x3b8   : > { %v752_v45 = vadd.f32 %v744_v6, %v1612_v3  ;;  %v753_v46 = vadd.f32 %v745_v40, %v1604_v1  ;;  %v792_v4 = vmul.f32 %v781_v44, %v1643_v11  ;;  %v793_v2 = vmul.f32 %v781_v44, %v1634_v9 }
 0x3b9   : > { %766 = vst [vmem:[%s1717_s6 + $0x30] sm:$0xff] %v758_v5  ;;  %767 = vst [vmem:[%s1717_s6 + $0x38] sm:$0xff] %v759_v41  ;;  %v748_v47 = vmul.f32 %v740_v42, %v1647_v12  ;;  %v749_v48 = vmul.f32 %v741_v43, %v1637_v10 }
 0x3ba   : > { %760 = vst [vmem:[%s1717_s6] sm:$0xff] %v752_v45  ;;  %761 = vst [vmem:[%s1717_s6 + $0x8] sm:$0xff] %v753_v46  ;;  %v800_v3 = vmul.f32 %v792_v4, %v1643_v11  ;;  %v801_v1 = vmul.f32 %v793_v2, %v1634_v9  ;;  %v786_v49 = vpop.permute.xlu1 %785 }
 0x3bb   : > { %v756_v50 = vadd.f32 %v748_v47, %v1643_v11  ;;  %v757_v51 = vadd.f32 %v749_v48, %v1634_v9  ;;  %v794_v52 = vmul.f32 %v786_v49, %v1659_v15  ;;  %v795_v53 = vmul.f32 %v786_v49, %v1650_v13 }
 0x3bc   : > { %v808_v54 = vadd.f32 %v800_v3, %v1647_v12  ;;  %v809_v55 = vadd.f32 %v801_v1, %v1637_v10 }
 0x3bd   : > { %764 = vst [vmem:[%s1717_s6 + $0x20] sm:$0xff] %v756_v50  ;;  %765 = vst [vmem:[%s1717_s6 + $0x28] sm:$0xff] %v757_v51  ;;  %v802_v11 = vmul.f32 %v794_v52, %v1659_v15  ;;  %v803_v9 = vmul.f32 %v795_v53, %v1650_v13 }
 0x3be   : > { %966 = vst [vmem:[%s1717_s6 + $0x60] sm:$0xff] %v808_v54  ;;  %967 = vst [vmem:[%s1717_s6 + $0x68] sm:$0xff] %v809_v55 }
 0x3bf   : > { %v810_v10 = vadd.f32 %v802_v11, %v1663_v16  ;;  %v811_v12 = vadd.f32 %v803_v9, %v1653_v14 }
 0x3c1   : > { %968 = vst [vmem:[%s1717_s6 + $0x70] sm:$0xff] %v810_v10  ;;  %969 = vst [vmem:[%s1717_s6 + $0x78] sm:$0xff] %v811_v12 }
 0x3c2   : > { %1330 = shalt.err (!%p1327_p11)
}
 0x3c3   : > { %s1331_s11 = scalar_lea.hbm %s1770_s7, 2048  ;;  %s1335_s26 = scalar_lea.hbm %s1824_s4, 4096 }
 0x3c4   : > { %p1332_p3 = scmp.ne.s32.totalorder %s1770_s7, %s1331_s11  ;;  %p1336_p2 = scmp.lt.u32.totalorder %s1770_s7, %s1824_s4 }
 0x3c5   : > { %p1337_p4 = scmp.lt.u32.totalorder %s1335_s26, %s1331_s11  ;;  %p1339_p13 = scmp.lt.u32.totalorder %s1331_s11, %s1770_s7 }
 0x3c6   : > { %p1333_p8 = pnand %p1332_p3, %p1834_p1 }
 0x3c7   : > { %p1338_p6 = por %p1337_p4, %p1336_p2 }
 0x3c8   : > { %p1334_p0 = pneg %p1333_p8 }
 0x3c9   : > { %p1340_p12 = por %p1339_p13, %p1338_p6 }
 0x3cb   : > { %p1341_p10 = pnand %p1340_p12, %p1334_p0 }
 0x3cd   : > { %1344 = shalt.err (!%p1341_p10)
}
 0x3ce   : > { %s1399_s6 = smov 256   ;;  %s1400_s9 = smov 16  }
 0x3cf   : > { %1167 = dma.vmem_to_hbm [thread:$0]  (%p1834_p1), %s1772_s8, 2048, %s1770_s7, %s822_s19, %s1399_s6, %s1399_s6, %s1400_s9  }
 0x3d0 PF: > { %s850_s25 = sand.u32 1, %s1375_s15   ;;  %p1835_p5 = scmp.ne.s32.totalorder %s1830_s28, 0 }
 0x3d1   : > { %p1836_p7 = scmp.ge.s32.totalorder %s1387_s18, 2  ;;  %s851_s5 = scalar_lea.sflag [#allocation4], %s850_s25 }
 0x3d3   : > { %p1177_p9 = pnand %p1836_p7, %p1835_p5 }
 0x3d5   : > { %1370 = dma.done.wait (!%p1177_p9), %s851_s5, 2048  }
 0x3d6   : > { %1372 = vsyncadd (!%p1177_p9), %s851_s5, 4294965248  ;;  %p20_p11 = scmp.ge.s32.totalorder %s1451_s21, 4   ;;  %s1837_s15 = smov %s1379_s16 }
 0x3d7   : > { %s1838_s16 = smov %s1383_s17  ;;  %s1839_s17 = smov %s1463_s24 }
 0x3d8   : > { %s1840_s18 = smov %s1451_s21  ;;  %22 = sbr.rel (!%p20_p11) target bundleno = 7 (0x7), region = 95 }
 0x3df   :  { %856 = vsyncpa [#allocation3], 1 }
 0x3e0   :  { %858 = vsyncpa [#allocation3 + $0x1], 1 }
 0x3e1   :  { %859 = vsyncpa [#allocation6], 1 }
 0x3e2   :  { %861 = vsyncpa [#allocation6 + $0x1], 1 }
 0x3e3   :  { %862 = vsyncpa [#allocation4], 1 }
 0x3e4   :  { %864 = vsyncpa [#allocation4 + $0x1], 1 }

</bundles_post_ra>
